<compile_context>
chip_gen: v7x
topology: tpu7x:2x2x1
jax: 0.10.0
libtpu: 0.0.40
codegen_flags: <defaults>
</compile_context>

<pallas_src>
import functools

import jax
import jax.numpy as jnp
from jax import lax
from jax.experimental import pallas as pl
from jax.experimental.pallas import tpu as pltpu

DIM_CITY = 10
CITY_VOC = 1733
NUM_RAW_FEATS = 92                  # 91 numeric columns + 1 city-id column
D_NUM = NUM_RAW_FEATS - 1           # 91
D_IN = D_NUM + DIM_CITY             # 101
D_PACK = 104                        # packed net-input width (101 -> mult. of 8)
HID = 99
HID_PAD = 128                       # lane-padded hidden width
TB_DEFAULT = 2048                   # rows per grid step (amortizes step overhead)
CHUNK = 256                         # rows per in-kernel compute chunk (vreg budget)
NT_DIMS = (((1,), (1,)), ((), ()))  # A @ B^T contraction (flash-style)


def _mlp_kernel(x_ref, w1_ref, b1_ref, w2t_ref, o_ref):
    # x:   [tile, 104]  packed net-input (91 numeric + 10 emb + 3 zeros), bf16/f32
    # w1:  [104, 128]   layer-1 weight, hidden padded 99 -> 128 (col 99.. zero)
    # b1:  [1, 128]     layer-1 bias; lane 99 == 1.0 (survives ReLU, carries b2)
    # w2t: [8, 128]     eight identical rows of [w2 | b2 | 0 ...]
    # o:   [1, tile]    lane-dense per-row outputs
    tile = x_ref.shape[0]
    chunk = CHUNK if tile % CHUNK == 0 else 128   # tile is always a mult. of 128
    w1 = w1_ref[...]
    b1 = b1_ref[...]
    w2t = w2t_ref[...]
    for c in range(tile // chunk):                # static unroll; values die at the store
        lo = c * chunk
        x = x_ref[lo:lo + chunk, :]
        h = jnp.dot(x, w1, preferred_element_type=jnp.float32)     # [chunk,128] f32
        h = jnp.maximum(h + b1, 0.0)                                # ReLU (+ bias fold)
        # Layer 2 (99 -> 1, + folded b2) as an NT matmul: result [8, chunk] has
        # the batch on the LANE axis, so row 0 stores as a full-width vst.
        y8 = lax.dot_general(w2t, h, NT_DIMS,
                             preferred_element_type=jnp.float32)    # [8, chunk]
        o_ref[:, lo:lo + chunk] = y8[0:1, :].astype(o_ref.dtype)


def init_params(key):
    """Matches the PyTorch module's initialization."""
    k1, k2, k3, k4, k5 = jax.random.split(key, 5)
    emb = jax.random.uniform(k1, (CITY_VOC, DIM_CITY), jnp.float32, -0.01, 0.01)
    bound1 = 1.0 / float(D_IN) ** 0.5
    w1 = jax.random.uniform(k2, (D_IN, HID), jnp.float32, -bound1, bound1)
    b1 = jax.random.uniform(k3, (1, HID), jnp.float32, -bound1, bound1)
    bound2 = 1.0 / float(HID) ** 0.5
    w2 = jax.random.uniform(k4, (HID, 1), jnp.float32, -bound2, bound2)
    b2 = jax.random.uniform(k5, (1, 1), jnp.float32, -bound2, bound2)
    return emb, w1, b1, w2, b2


def pack_params(w1, b1, w2, b2, act_dtype):
    """Pad/fold weights so concat, both biases and the 99->1 layer fuse in-kernel."""
    w1p = jnp.zeros((D_PACK, HID_PAD), jnp.float32).at[:D_IN, :HID].set(w1)
    b1p = jnp.zeros((1, HID_PAD), jnp.float32).at[0, :HID].set(jnp.reshape(b1, (-1,)))
    b1p = b1p.at[0, HID].set(1.0)                 # ReLU(1.0) == 1.0 exactly
    w2row = jnp.zeros((HID_PAD,), jnp.float32).at[:HID].set(jnp.reshape(w2, (-1,)))
    w2row = w2row.at[HID].set(jnp.reshape(b2, (-1,))[0])   # constant lane carries b2
    w2t8 = jnp.tile(w2row[None, :], (8, 1))       # M=8 keeps the NT matmul tile-aligned
    return w1p.astype(act_dtype), b1p, w2t8


def mixed_net_forward(features, params, *, tb=TB_DEFAULT, act_dtype=jnp.bfloat16):
    emb, w1, b1, w2, b2 = params
    w1p, b1p, w2t8 = pack_params(w1, b1, w2, b2, act_dtype)

    B = features.shape[0]
    # Batch tiling: tile % 128 == 0 (lane-dense output blocks); when the batch is
    # big enough, keep >= 2 programs so the "parallel" axis can use both v7x TCs.
    bp = pl.cdiv(max(B, 1), 128) * 128
    tile = min(tb, bp)
    if bp >= 2 * 128:
        tile = min(tile, max(128, ((bp // 2) // 128) * 128))
    bp = pl.cdiv(bp, tile) * tile

    if bp != B:
        features = jnp.pad(features, ((0, bp - B), (0, 0)))   # city id 0 is valid

    # Fuse gather + concat + pad + cast into ONE bf16 net-input stream so the
    # kernel reads a single [bp, 104] array: no (tile, 10) lane-padded VMEM
    # block, no second DMA stream, one K=104 matmul.
    # city id carried as f32 -> int32 is exact for ids < 2**24 (voc = 1733).
    city_idx = features[:, -1].astype(jnp.int32)
    city_e = jnp.take(emb, city_idx, axis=0)                       # [bp, 10]
    net_in = jnp.concatenate(
        [features[:, :D_NUM], city_e,
         jnp.zeros((bp, D_PACK - D_IN), features.dtype)], axis=1).astype(act_dtype)

    grid = (bp // tile,)
    out = pl.pallas_call(
        _mlp_kernel,
        out_shape=jax.ShapeDtypeStruct((bp // tile, tile), jnp.float32),
        grid=grid,
        in_specs=[
            pl.BlockSpec((tile, D_PACK), lambda i: (i, 0)),
            # Constant block index -> weights fetched once, resident across tiles.
            pl.BlockSpec((D_PACK, HID_PAD), lambda i: (0, 0)),
            pl.BlockSpec((1, HID_PAD), lambda i: (0, 0)),
            pl.BlockSpec((8, HID_PAD), lambda i: (0, 0)),
        ],
        # Lane-dense (1, tile) output blocks: full-width stores, contiguous HBM
        # writeback, ~tile*4 B per step instead of a 128x-padded column.
        out_specs=pl.BlockSpec((1, tile), lambda i: (i, 0)),
        compiler_params=pltpu.CompilerParams(
            dimension_semantics=("parallel",)),   # shard tiles across v7x's 2 TCs
        # NOTE: ~1.2 MB of VMEM at tile=2048 -> no vmem_limit override needed.
        # If profiling ever shows exposed DMA at step boundaries, add
        # pipeline_mode=pl.Buffered(3) on the net-input BlockSpec.
    )(net_in, w1p, b1p, w2t8)

    # (n_tiles, tile) is contiguous row-major -> free reshape; then .unsqueeze(2).
    return out.reshape(bp)[:B].reshape(B, 1, 1)


def _reference_forward(features, params):
    """Pure-JAX reference (mirrors the PyTorch module)."""
    emb, w1, b1, w2, b2 = params
    city_idx = features[:, -1].astype(jnp.int32)
    city_vals = jnp.take(emb, city_idx, axis=0)
    net_in = jnp.concatenate([features[:, :-1], city_vals], axis=1)
    h = jnp.maximum(net_in @ w1 + b1, 0.0)
    return (h @ w2 + b2)[:, :, None]


if __name__ == "__main__":
    key = jax.random.PRNGKey(0)
    kparam, kfeat, kcity = jax.random.split(key, 3)
    params = init_params(kparam)

    fwd = jax.jit(mixed_net_forward, static_argnames=("tb", "act_dtype"))

    # Small batch (non-multiple of 8/128), single-tile grid.
    B = 10
    numeric = jax.random.normal(kfeat, (B, D_NUM), jnp.float32)
    city_ids = jax.random.randint(kcity, (B, 1), 0, CITY_VOC).astype(jnp.float32)
    features = jnp.concatenate([numeric, city_ids], axis=1)        # [B, 92]

    ref = jax.block_until_ready(_reference_forward(features, params))

    # Exact-parity mode (f32 streams).
    out_f32 = jax.block_until_ready(fwd(features, params, act_dtype=jnp.float32))
    assert out_f32.shape == (B, 1, 1), out_f32.shape
    assert jnp.allclose(out_f32, ref, atol=2e-4, rtol=2e-4), "f32 mismatch vs reference"

    # Default fast mode (bf16 streams, f32 accumulation) -> looser tolerance.
    out_bf16 = jax.block_until_ready(fwd(features, params))
    assert out_bf16.shape == (B, 1, 1), out_bf16.shape
    assert jnp.allclose(out_bf16, ref, atol=3e-2, rtol=3e-2), "bf16 mismatch vs reference"

    # Multi-tile grid path (exercises the parallel batch axis + padding slice-off).
    B2 = 300
    k2a, k2b = jax.random.split(kfeat)
    numeric2 = jax.random.normal(k2a, (B2, D_NUM), jnp.float32)
    city2 = jax.random.randint(k2b, (B2, 1), 0, CITY_VOC).astype(jnp.float32)
    feats2 = jnp.concatenate([numeric2, city2], axis=1)
    out2 = jax.block_until_ready(fwd(feats2, params))
    ref2 = jax.block_until_ready(_reference_forward(feats2, params))
    assert out2.shape == (B2, 1, 1), out2.shape
    assert jnp.allclose(out2, ref2, atol=3e-2, rtol=3e-2), "multi-tile mismatch vs reference"

    print("KERNEL_OK")
</pallas_src>

<mosaic_0001>
module attributes {stable_mosaic.version = 11 : i64} {
  func.func @_mlp_kernel(%arg0: i32, %arg1: memref<128x104xf32, #tpu.memory_space<vmem>>, %arg2: memref<104x128xf32, #tpu.memory_space<vmem>>, %arg3: memref<1x128xf32, #tpu.memory_space<vmem>>, %arg4: memref<8x128xf32, #tpu.memory_space<vmem>>, %arg5: memref<1x128xf32, #tpu.memory_space<vmem>>) attributes {dimension_semantics = [#tpu.dimension_semantics<parallel>], iteration_bounds = array<i64: 1>, scalar_prefetch = 0 : i64, scratch_operands = 0 : i64, tpu.core_type = #tpu.core_type<tc>, window_params = [{transform_indices = @transform_0, window_bounds = array<i64: 128, 104>}, {pipeline_mode = #tpu.pipeline_mode<synchronous>, transform_indices = @transform_1, window_bounds = array<i64: 104, 128>}, {pipeline_mode = #tpu.pipeline_mode<synchronous>, transform_indices = @transform_2, window_bounds = array<i64: 1, 128>}, {pipeline_mode = #tpu.pipeline_mode<synchronous>, transform_indices = @transform_3, window_bounds = array<i64: 8, 128>}, {transform_indices = @transform_4, window_bounds = array<i64: 1, 128>}]} {
    %c0 = arith.constant 0 : index
    %c0_0 = arith.constant 0 : index
    %0 = vector.load %arg2[%c0, %c0_0] : memref<104x128xf32, #tpu.memory_space<vmem>>, vector<104x128xf32>
    %c0_1 = arith.constant 0 : index
    %c0_2 = arith.constant 0 : index
    %1 = vector.load %arg3[%c0_1, %c0_2] : memref<1x128xf32, #tpu.memory_space<vmem>>, vector<1x128xf32>
    %c0_3 = arith.constant 0 : index
    %c0_4 = arith.constant 0 : index
    %2 = vector.load %arg4[%c0_3, %c0_4] : memref<8x128xf32, #tpu.memory_space<vmem>>, vector<8x128xf32>
    %c0_5 = arith.constant 0 : index
    %c0_6 = arith.constant 0 : index
    %3 = vector.load %arg1[%c0_5, %c0_6] : memref<128x104xf32, #tpu.memory_space<vmem>>, vector<128x104xf32>
    %cst = arith.constant dense<0.000000e+00> : vector<128x128xf32>
    %4 = tpu.matmul %3, %0, %cst {dimension_numbers = #tpu.dot_dimension_numbers<[1], [0], [0], [1], [0, 0, 1, 1], [], []>} : vector<128x104xf32>, vector<104x128xf32>, vector<128x128xf32> -> vector<128x128xf32>
    %5 = vector.broadcast %1 : vector<1x128xf32> to vector<128x128xf32>
    %6 = arith.addf %4, %5 : vector<128x128xf32>
    %cst_7 = arith.constant 0.000000e+00 : f32
    %7 = vector.broadcast %cst_7 : f32 to vector<128x128xf32>
    %8 = arith.maximumf %6, %7 : vector<128x128xf32>
    %cst_8 = arith.constant dense<0.000000e+00> : vector<8x128xf32>
    %9 = tpu.matmul %2, %8, %cst_8 {dimension_numbers = #tpu.dot_dimension_numbers<[1], [1], [0], [0], [0, 0, 1, 0], [], []>} : vector<8x128xf32>, vector<128x128xf32>, vector<8x128xf32> -> vector<8x128xf32>
    %10 = vector.extract_strided_slice %9 {offsets = [0, 0], sizes = [1, 128], strides = [1, 1]} : vector<8x128xf32> to vector<1x128xf32>
    %c0_9 = arith.constant 0 : index
    %c0_10 = arith.constant 0 : index
    %11 = vector.load %arg5[%c0_9, %c0_10] : memref<1x128xf32, #tpu.memory_space<vmem>>, vector<1x128xf32>
    tpu.vector_store %arg5[%c0_9, %c0_10], %10 {strides = array<i32>} : memref<1x128xf32, #tpu.memory_space<vmem>>, vector<1x128xf32>,
    return
  }
  func.func @transform_0(%arg0: i32) -> (i32, i32) {
    %c0_i32 = arith.constant 0 : i32
    %c0_i32_0 = arith.constant 0 : i32
    return %arg0, %c0_i32 : i32, i32
  }
  func.func @transform_1(%arg0: i32) -> (i32, i32) {
    %c0_i32 = arith.constant 0 : i32
    %c0_i32_0 = arith.constant 0 : i32
    %c0_i32_1 = arith.constant 0 : i32
    return %c0_i32, %c0_i32_0 : i32, i32
  }
  func.func @transform_2(%arg0: i32) -> (i32, i32) {
    %c0_i32 = arith.constant 0 : i32
    %c0_i32_0 = arith.constant 0 : i32
    %c0_i32_1 = arith.constant 0 : i32
    return %c0_i32, %c0_i32_0 : i32, i32
  }
  func.func @transform_3(%arg0: i32) -> (i32, i32) {
    %c0_i32 = arith.constant 0 : i32
    %c0_i32_0 = arith.constant 0 : i32
    %c0_i32_1 = arith.constant 0 : i32
    return %c0_i32, %c0_i32_0 : i32, i32
  }
  func.func @transform_4(%arg0: i32) -> (i32, i32) {
    %c0_i32 = arith.constant 0 : i32
    %c0_i32_0 = arith.constant 0 : i32
    return %arg0, %c0_i32 : i32, i32
  }
}

</mosaic_0001>

<bundles_post_ra>
// kernel: mixed_net_forward.1
= control target key start
LH: loop header
LB: loop body
LE: loop exit
PB: predicated region body
PF: predicated region fallthrough
CT: control target
= control target key end

     0   :  { %vm54_vm0 = vcmask 850944   ;;  %v538_v35 = vmov 0.0|0.0   ;;  %vm539_vm1 = vmmov 0   ;;  %v540_v36 = vmov 0.0   ;;  %s686_s1 = inlined_call_operand.vmem [shape: f32[104,128], index: 1, kind: input, shape index: {}]   ;;  %s687_s0 = inlined_call_operand.vmem [shape: f32[128,104], index: 0, kind: input, shape index: {}]   ;;  %s688_s2 = inlined_call_operand.vmem [shape: f32[1,128], index: 2, kind: input, shape index: {}]   ;;  %s689_s3 = inlined_call_operand.vmem [shape: f32[8,128], index: 3, kind: input, shape index: {}]   ;;  %s690_s4 = inlined_call_operand.vmem [shape: f32[1,128], index: 4, kind: output, shape index: {}]  }
   0x1   :  { %v17_v0 = vld [vmem:[%s686_s1] sm:$0xff]  ;;  %v18_v1 = vld [vmem:[%s686_s1 + $0x8] sm:$0xff]  ;;  %v19_v2 = vld [vmem:[%s686_s1 + $0x10] sm:$0xff]  ;;  %511 = vmatprep.subr.bf16.mxu1 %v538_v35  ;;  %484 = vmatprep.mubr.msk.f32.mxu1 %vm539_vm1, %v540_v36 }
   0x2   :  { %v487_v3 = vpack.c.bf16 %v18_v1, %v17_v0  ;;  %v20_v4 = vld [vmem:[%s686_s1 + $0x18] sm:$0xff]  ;;  %v21_v6 = vld [vmem:[%s686_s1 + $0x20] sm:$0xff]  ;;  %v22_v7 = vld [vmem:[%s686_s1 + $0x28] sm:$0xff] }
   0x3   :  { %v491_v5 = vpack.c.bf16 %v20_v4, %v19_v2  ;;  %v32_v8 = vld [vmem:[%s687_s0] sm:$0xff]  ;;  %v495_v9 = vpack.c.bf16 %v22_v7, %v21_v6  ;;  %v23_v10 = vld [vmem:[%s686_s1 + $0x30] sm:$0xff]  ;;  %v24_v11 = vld [vmem:[%s686_s1 + $0x38] sm:$0xff] }
   0x4   :  { %488 = vmatprep.subr.bf16.mxu0 %v487_v3  ;;  %428 = vmatprep.mubr.msk.f32.mxu0 %vm54_vm0, %v32_v8  ;;  %v499_v12 = vpack.c.bf16 %v24_v11, %v23_v10  ;;  %v25_v13 = vld [vmem:[%s686_s1 + $0x40] sm:$0xff]  ;;  %v26_v14 = vld [vmem:[%s686_s1 + $0x48] sm:$0xff]  ;;  %v27_v16 = vld [vmem:[%s686_s1 + $0x50] sm:$0xff] }
   0x5   :  { %490 = vmatpush3.bf16.msra.mxu0 %v487_v3  ;;  %v503_v15 = vpack.c.bf16 %v26_v14, %v25_v13  ;;  %v28_v17 = vld [vmem:[%s686_s1 + $0x58] sm:$0xff]  ;;  %v29_v19 = vld [vmem:[%s686_s1 + $0x60] sm:$0xff]  ;;  %v33_v20 = vld [vmem:[%s687_s0 + $0x8] sm:$0xff] }
   0x6   :  { %492 = vmatprep.subr.bf16.mxu0 %v491_v5  ;;  %v507_v18 = vpack.c.bf16 %v28_v17, %v27_v16  ;;  %v34_v21 = vld [vmem:[%s687_s0 + $0x10] sm:$0xff]  ;;  %v35_v22 = vld [vmem:[%s687_s0 + $0x18] sm:$0xff]  ;;  %v36_v23 = vld [vmem:[%s687_s0 + $0x20] sm:$0xff] }
   0x7   :  { %v37_v24 = vld [vmem:[%s687_s0 + $0x28] sm:$0xff]  ;;  %v38_v25 = vld [vmem:[%s687_s0 + $0x30] sm:$0xff]  ;;  %v39_v26 = vld [vmem:[%s687_s0 + $0x38] sm:$0xff] }
   0x8   :  { %v40_v27 = vld [vmem:[%s687_s0 + $0x40] sm:$0xff]  ;;  %v41_v28 = vld [vmem:[%s687_s0 + $0x48] sm:$0xff]  ;;  %v42_v29 = vld [vmem:[%s687_s0 + $0x50] sm:$0xff] }
   0x9   :  { %494 = vmatpush3.bf16.msra.mxu0 %v491_v5  ;;  %v43_v30 = vld [vmem:[%s687_s0 + $0x58] sm:$0xff]  ;;  %v44_v31 = vld [vmem:[%s687_s0 + $0x60] sm:$0xff]  ;;  %v45_v32 = vld [vmem:[%s687_s0 + $0x68] sm:$0xff] }
   0xa   :  { %496 = vmatprep.subr.bf16.mxu0 %v495_v9  ;;  %v46_v33 = vld [vmem:[%s687_s0 + $0x70] sm:$0xff]  ;;  %v47_v34 = vld [vmem:[%s687_s0 + $0x78] sm:$0xff]  ;;  %v339_v37 = vld [vmem:[%s688_s2] ss:$0 sm:$0xff] }
   0xd   :  { %498 = vmatpush3.bf16.msra.mxu0 %v495_v9 }
   0xe   :  { %500 = vmatprep.subr.bf16.mxu0 %v499_v12 }
  0x11   :  { %502 = vmatpush3.bf16.msra.mxu0 %v499_v12 }
  0x12   :  { %504 = vmatprep.subr.bf16.mxu0 %v503_v15 }
  0x15   :  { %506 = vmatpush3.bf16.msra.mxu0 %v503_v15 }
  0x16   :  { %508 = vmatprep.subr.bf16.mxu0 %v507_v18 }
  0x19   :  { %510 = vmatpush3.bf16.msra.mxu0 %v507_v18 }
  0x1a   :  { %426 = vmatprep.subr.mxu0 %v29_v19 }
  0x1d   :  { %427 = vmatpush3.msra.mxu0 %v29_v19 }
  0x1e   :  { %429 = vmatmul.mubr.msk.f32.vlgmr.msra.gmra.mrb[0].mxu0 %vm54_vm0, %v33_v20 }
  0x1f   :  { %431 = vmatprep.mubr.msk.f32.mxu0 %vm54_vm0, %v34_v21 }
  0x22   :  { %432 = vmatmul.mubr.msk.f32.gmra.mrb[2].mxu0 %vm54_vm0, %v35_v22 }
  0x23   :  { %434 = vmatprep.mubr.msk.f32.mxu0 %vm54_vm0, %v36_v23 }
  0x26   :  { %435 = vmatmul.mubr.msk.f32.gmra.mrb[4].mxu0 %vm54_vm0, %v37_v24 }
  0x27   :  { %437 = vmatprep.mubr.msk.f32.mxu0 %vm54_vm0, %v38_v25 }
  0x2a   :  { %438 = vmatmul.mubr.msk.f32.gmra.mrb[6].mxu0 %vm54_vm0, %v39_v26 }
  0x2b   :  { %440 = vmatprep.mubr.msk.f32.mxu0 %vm54_vm0, %v40_v27 }
  0x2e   :  { %441 = vmatmul.mubr.msk.f32.gmra.mrb[8].mxu0 %vm54_vm0, %v41_v28 }
  0x2f   :  { %443 = vmatprep.mubr.msk.f32.mxu0 %vm54_vm0, %v42_v29 }
  0x32   :  { %444 = vmatmul.mubr.msk.f32.gmra.mrb[10].mxu0 %vm54_vm0, %v43_v30  ;;  %v31_v30 = vld [vmem:[%s689_s3] sm:$0xff] }
  0x33   :  { %446 = vmatprep.mubr.msk.f32.mxu0 %vm54_vm0, %v44_v31 }
  0x36   :  { %447 = vmatmul.mubr.msk.f32.gmra.mrb[12].mxu0 %vm54_vm0, %v45_v32 }
  0x37   :  { %449 = vmatprep.mubr.msk.f32.mxu0 %vm54_vm0, %v46_v33 }
  0x3a   :  { %450 = vmatmul.mubr.msk.f32.gmra.mrb[14].mxu0 %vm54_vm0, %v47_v34 }
  0xf1   :  { %v430_v38 = vpop.f32.mrb[0].mxu0 }
  0xf2   :  { %v175_v39 = vadd.f32 %v430_v38, %v339_v37  ;;  %v169_v40 = vpop.f32.mrb[1].mxu0 }
  0xf3   :  { %v170_v41 = vadd.f32 %v339_v37, %v169_v40 }
  0xf4   :  { %v249_v42 = vmax.f32 %v175_v39, 0.0 }
  0xf5   :  { %v248_v43 = vmax.f32 %v170_v41, 0.0  ;;  %v433_v44 = vpop.f32.mrb[2].mxu0 }
  0xf6   :  { %v185_v45 = vadd.f32 %v433_v44, %v339_v37  ;;  %v179_v46 = vpop.f32.mrb[3].mxu0 }
  0xf7   :  { %v180_v47 = vadd.f32 %v339_v37, %v179_v46  ;;  %v512_v48 = vpack.c.bf16 %v249_v42, %v248_v43 }
  0xf8   :  { %v251_v49 = vmax.f32 %v185_v45, 0.0 }
  0xf9   :  { %v250_v50 = vmax.f32 %v180_v47, 0.0  ;;  %513 = vmatpush3.bf16.xpose.msra.mxu1 %v512_v48  ;;  %v436_v51 = vpop.f32.mrb[4].mxu0 }
  0xfa   :  { %v195_v52 = vadd.f32 %v436_v51, %v339_v37  ;;  %514 = vmatprep.subr.bf16.mxu1 %v538_v35  ;;  %v189_v53 = vpop.f32.mrb[5].mxu0 }
  0xfb   :  { %v515_v54 = vpack.c.bf16 %v251_v49, %v250_v50  ;;  %v190_v55 = vadd.f32 %v339_v37, %v189_v53 }
  0xfc   :  { %v253_v56 = vmax.f32 %v195_v52, 0.0 }
  0xfd   :  { %v252_v57 = vmax.f32 %v190_v55, 0.0  ;;  %v439_v58 = vpop.f32.mrb[6].mxu0 }
  0xfe   :  { %v205_v59 = vadd.f32 %v439_v58, %v339_v37  ;;  %v199_v60 = vpop.f32.mrb[7].mxu0 }
  0xff   :  { %v518_v61 = vpack.c.bf16 %v253_v56, %v252_v57  ;;  %v200_v62 = vadd.f32 %v339_v37, %v199_v60 }
 0x100   :  { %v255_v63 = vmax.f32 %v205_v59, 0.0 }
 0x101   :  { %516 = vmatpush3.bf16.xpose.msra.mxu1 %v515_v54  ;;  %v254_v0 = vmax.f32 %v200_v62, 0.0  ;;  %v442_v1 = vpop.f32.mrb[8].mxu0 }
 0x102   :  { %517 = vmatprep.subr.bf16.mxu1 %v538_v35  ;;  %v215_v2 = vadd.f32 %v442_v1, %v339_v37  ;;  %v209_v3 = vpop.f32.mrb[9].mxu0 }
 0x103   :  { %v521_v4 = vpack.c.bf16 %v255_v63, %v254_v0  ;;  %v210_v5 = vadd.f32 %v339_v37, %v209_v3 }
 0x104   :  { %v257_v6 = vmax.f32 %v215_v2, 0.0 }
 0x105   :  { %v256_v7 = vmax.f32 %v210_v5, 0.0  ;;  %v445_v8 = vpop.f32.mrb[10].mxu0 }
 0x106   :  { %v225_v9 = vadd.f32 %v445_v8, %v339_v37  ;;  %v219_v10 = vpop.f32.mrb[11].mxu0 }
 0x107   :  { %v524_v11 = vpack.c.bf16 %v257_v6, %v256_v7  ;;  %v220_v12 = vadd.f32 %v339_v37, %v219_v10 }
 0x108   :  { %v259_v13 = vmax.f32 %v225_v9, 0.0 }
 0x109   :  { %519 = vmatpush3.bf16.xpose.msra.mxu1 %v518_v61  ;;  %v258_v14 = vmax.f32 %v220_v12, 0.0  ;;  %v448_v15 = vpop.f32.mrb[12].mxu0 }
 0x10a   :  { %520 = vmatprep.subr.bf16.mxu1 %v538_v35  ;;  %v235_v16 = vadd.f32 %v448_v15, %v339_v37  ;;  %v229_v17 = vpop.f32.mrb[13].mxu0 }
 0x10b   :  { %v527_v18 = vpack.c.bf16 %v259_v13, %v258_v14  ;;  %v230_v19 = vadd.f32 %v339_v37, %v229_v17 }
 0x10c   :  { %v261_v20 = vmax.f32 %v235_v16, 0.0 }
 0x10d   :  { %v260_v21 = vmax.f32 %v230_v19, 0.0  ;;  %v451_v22 = vpop.f32.mrb[14].mxu0 }
 0x10e   :  { %v245_v23 = vadd.f32 %v451_v22, %v339_v37  ;;  %v239_v24 = vpop.f32.mrb[15].mxu0 }
 0x10f   :  { %v530_v25 = vpack.c.bf16 %v261_v20, %v260_v21  ;;  %v240_v26 = vadd.f32 %v339_v37, %v239_v24 }
 0x110   :  { %v263_v27 = vmax.f32 %v245_v23, 0.0 }
 0x111   :  { %522 = vmatpush3.bf16.xpose.msra.mxu1 %v521_v4  ;;  %v262_v28 = vmax.f32 %v240_v26, 0.0 }
 0x112   :  { %523 = vmatprep.subr.bf16.mxu1 %v538_v35 }
 0x113   :  { %v533_v29 = vpack.c.bf16 %v263_v27, %v262_v28 }
 0x119   :  { %525 = vmatpush3.bf16.xpose.msra.mxu1 %v524_v11 }
 0x11a   :  { %526 = vmatprep.subr.bf16.mxu1 %v538_v35 }
 0x121   :  { %528 = vmatpush3.bf16.xpose.msra.mxu1 %v527_v18 }
 0x122   :  { %529 = vmatprep.subr.bf16.mxu1 %v538_v35 }
 0x129   :  { %531 = vmatpush3.bf16.xpose.msra.mxu1 %v530_v25 }
 0x12a   :  { %532 = vmatprep.subr.bf16.mxu1 %v538_v35 }
 0x131   :  { %534 = vmatpush3.bf16.xpose.msra.mxu1 %v533_v29 }
 0x138   :  { %485 = vmatmul.mubr.f32.vlgmr.msra.gmra.mrb[0].mxu1 %v31_v30 }
 0x20b   :  { %v330_v31 = vpop.f32.mrb[0].mxu1 }
 0x20c   :  { %334 = vst [vmem:[%s690_s4] sm:$0x1] %v330_v31  ;;  %v486_v32 = vpop.f32.mrb[1].mxu1 }

</bundles_post_ra>
